<compile_context>
chip_gen: v6e
topology: v6e:2x2x1
jax: 0.10.0
libtpu: 0.0.40
codegen_flags: <defaults>
</compile_context>

<pallas_src>
import functools

import jax
import jax.numpy as jnp
from jax.experimental import pallas as pl
from jax.experimental.pallas import tpu as pltpu


def _round_up(x, m):
    return (x + m - 1) // m * m


def _cdiv(a, b):
    return -(-a // b)


def _critic_kernel(x_ref, w_in_ref, b1_ref, w2h_ref, b2_ref, w3_ref, b3_ref,
                   out_ref):
    hidden1 = b1_ref.shape[1]

    # Fused fc1 + action-branch of fc2: one bf16 MXU pass, f32 accumulation.
    h12 = jnp.dot(x_ref[...], w_in_ref[...],
                  preferred_element_type=jnp.float32)        # (TB, H1+H2) f32

    # fc1 + ReLU  (bias add / ReLU in f32; cast only to feed the next MXU op).
    h1 = jnp.maximum(h12[:, :hidden1] + b1_ref[...], 0.0).astype(jnp.bfloat16)

    # fc2 on concat([h1, action]) == h1 @ W2h + action @ W2a, then ReLU.
    h2 = jnp.maximum(
        jnp.dot(h1, w2h_ref[...], preferred_element_type=jnp.float32)
        + h12[:, hidden1:] + b2_ref[...],
        0.0)                                                  # (TB, H2) f32

    # fc3 as (1,H2) x (TB,H2)^T -> (1,TB): batch ends up on lanes, so the
    # store is lane-dense and the HBM write is 4 bytes per batch row.
    q = jax.lax.dot_general(
        w3_ref[...], h2,
        dimension_numbers=(((1,), (1,)), ((), ())),
        preferred_element_type=jnp.float32)                   # (1, TB) f32
    out_ref[0] = q + b3_ref[...]


@functools.partial(jax.jit, static_argnames=("block_b",))
def critic_forward(state, action, params, *, block_b=1024):
    """Full Critic forward in one batch-tiled Pallas kernel. Returns (B, 1) f32."""
    w_in, b1, w2h, b2, w3, b3 = params
    B = state.shape[0]
    in_feat = w_in.shape[0]
    hidden1 = b1.shape[1]
    hidden2 = b2.shape[1]
    assert state.shape[1] + action.shape[1] == in_feat

    # Tile selection: multiple of 16 rows (bf16 sublane packing), as fat as
    # block_b allows; force >= 2 grid steps for big batches so v7x's second
    # TensorCore is used (dimension_semantics=("parallel",)).
    B16 = _round_up(B, 16)
    ntiles = max(1, _cdiv(B16, block_b))
    if ntiles == 1 and B16 >= 512:
        ntiles = 2
    TB = _round_up(_cdiv(B16, ntiles), 16)
    Bp = TB * ntiles

    # Fused bf16 input [state | action]; pad batch to the tile multiple.
    x = jnp.concatenate([state, action], axis=1).astype(jnp.bfloat16)
    if Bp != B:
        x = jnp.pad(x, ((0, Bp - B), (0, 0)))

    batch_map = lambda i: (i, 0)    # tile that moves with the batch grid
    const_map = lambda i: (0, 0)    # constant block index -> DMA'd once, resident

    out_tiled = pl.pallas_call(
        _critic_kernel,
        out_shape=jax.ShapeDtypeStruct((ntiles, 1, TB), jnp.float32),
        grid=(ntiles,),
        in_specs=[
            pl.BlockSpec((TB, in_feat), batch_map),                 # x      bf16
            pl.BlockSpec((in_feat, hidden1 + hidden2), const_map),  # W_in   bf16
            pl.BlockSpec((1, hidden1), const_map),                  # b1     f32
            pl.BlockSpec((hidden1, hidden2), const_map),            # W2h    bf16
            pl.BlockSpec((1, hidden2), const_map),                  # b2     f32
            pl.BlockSpec((1, hidden2), const_map),                  # w3 row f32
            pl.BlockSpec((1, 1), const_map),                        # b3     f32
        ],
        out_specs=pl.BlockSpec((1, 1, TB), lambda i: (i, 0, 0)),
        compiler_params=pltpu.CompilerParams(
            dimension_semantics=("parallel",)),
    )(x, w_in, b1, w2h, b2, w3, b3)

    # Row i*TB + j of the batch lives at out_tiled[i, 0, j]; padded rows dropped.
    return out_tiled.reshape(-1)[:B].reshape(B, 1)


def init_critic_params(key, state_size, action_size, hidden1=256, hidden2=128):
    """Deterministic init mirroring Critic.reset_parameters (synthetic).

    Returns kernel-ready params:
      w_in : (S+A, H1+H2) bf16 packed block weight [[W1, 0], [0, W2a]]
      b1   : (1, H1)  f32
      w2h  : (H1, H2) bf16   (hidden part of fc2)
      b2   : (1, H2)  f32
      w3   : (1, H2)  f32    (fc3 weight row)
      b3   : (1, 1)   f32
    """
    k1, k2, k3, kb1, kb2, kb3 = jax.random.split(key, 6)

    lim1 = 1.0 / (hidden1 ** 0.5)
    lim2 = 1.0 / (hidden2 ** 0.5)

    w1 = jax.random.uniform(k1, (state_size, hidden1),
                            minval=-lim1, maxval=lim1, dtype=jnp.float32)
    b1 = jax.random.uniform(kb1, (1, hidden1),
                            minval=-lim1, maxval=lim1, dtype=jnp.float32)

    w2_full = jax.random.uniform(k2, (hidden1 + action_size, hidden2),
                                 minval=-lim2, maxval=lim2, dtype=jnp.float32)
    w2h = w2_full[:hidden1]      # multiplies h1
    w2a = w2_full[hidden1:]      # multiplies action
    b2 = jax.random.uniform(kb2, (1, hidden2),
                            minval=-lim2, maxval=lim2, dtype=jnp.float32)

    w3 = jax.random.uniform(k3, (1, hidden2),
                            minval=-0.003, maxval=0.003, dtype=jnp.float32)
    b3 = jax.random.uniform(kb3, (1, 1),
                            minval=-0.003, maxval=0.003, dtype=jnp.float32)

    # Packed first-stage block weight: [state|action] @ w_in gives
    # [state @ W1 | action @ W2a] in one MXU pass.
    w_in = jnp.zeros((state_size + action_size, hidden1 + hidden2), jnp.float32)
    w_in = w_in.at[:state_size, :hidden1].set(w1)
    w_in = w_in.at[state_size:, hidden1:].set(w2a)

    return (w_in.astype(jnp.bfloat16), b1,
            w2h.astype(jnp.bfloat16), b2, w3, b3)


def critic_reference(state, action, params, *, mxu_dtype=jnp.bfloat16):
    """Pure-JAX reference. mxu_dtype=bf16 mirrors the kernel's precision path;
    mxu_dtype=f32 gives a (looser) full-precision sanity check."""
    w_in, b1, w2h, b2, w3, b3 = params
    hidden1 = b1.shape[1]
    cast = lambda a: a.astype(mxu_dtype)

    x = jnp.concatenate([state, action], axis=1)
    h12 = jnp.dot(cast(x), w_in.astype(mxu_dtype),
                  preferred_element_type=jnp.float32)
    h1 = jax.nn.relu(h12[:, :hidden1] + b1)
    h2 = jax.nn.relu(jnp.dot(cast(h1), w2h.astype(mxu_dtype),
                             preferred_element_type=jnp.float32)
                     + h12[:, hidden1:] + b2)
    q = jnp.dot(h2, w3.T.astype(jnp.float32),
                preferred_element_type=jnp.float32) + b3
    return q


if __name__ == "__main__":
    # Small shapes consistent with the module (Reacher-style continuous
    # control, module-default hidden sizes 256 / 128).
    batch = 32
    state_size = 33
    action_size = 4

    key = jax.random.PRNGKey(0)
    kp, ks, ka = jax.random.split(key, 3)

    params = init_critic_params(kp, state_size, action_size)
    state = jax.random.normal(ks, (batch, state_size), dtype=jnp.float32)
    action = jax.random.normal(ka, (batch, action_size), dtype=jnp.float32)

    q = jax.block_until_ready(critic_forward(state, action, params))

    q_ref_bf16 = critic_reference(state, action, params, mxu_dtype=jnp.bfloat16)
    q_ref_f32 = critic_reference(state, action, params, mxu_dtype=jnp.float32)

    assert q.shape == (batch, 1)
    assert jnp.allclose(q, q_ref_bf16, atol=2e-3, rtol=2e-3), \
        "mismatch vs bf16-path reference"
    assert jnp.allclose(q, q_ref_f32, atol=2e-2, rtol=2e-2), \
        "mismatch vs f32 reference"

    print("KERNEL_OK")
</pallas_src>

<mosaic_0001>
module attributes {stable_mosaic.version = 11 : i64} {
  func.func @_critic_kernel(%arg0: i32, %arg1: memref<32x37xbf16, #tpu.memory_space<vmem>>, %arg2: memref<37x384xbf16, #tpu.memory_space<vmem>>, %arg3: memref<1x256xf32, #tpu.memory_space<vmem>>, %arg4: memref<256x128xbf16, #tpu.memory_space<vmem>>, %arg5: memref<1x128xf32, #tpu.memory_space<vmem>>, %arg6: memref<1x128xf32, #tpu.memory_space<vmem>>, %arg7: memref<1x1xf32, #tpu.memory_space<vmem>>, %arg8: memref<1x1x32xf32, #tpu.memory_space<vmem>>) attributes {dimension_semantics = [#tpu.dimension_semantics<parallel>], iteration_bounds = array<i64: 1>, scalar_prefetch = 0 : i64, scratch_operands = 0 : i64, tpu.core_type = #tpu.core_type<tc>, window_params = [{transform_indices = @transform_0, window_bounds = array<i64: 32, 37>}, {pipeline_mode = #tpu.pipeline_mode<synchronous>, transform_indices = @transform_1, window_bounds = array<i64: 37, 384>}, {pipeline_mode = #tpu.pipeline_mode<synchronous>, transform_indices = @transform_2, window_bounds = array<i64: 1, 256>}, {pipeline_mode = #tpu.pipeline_mode<synchronous>, transform_indices = @transform_3, window_bounds = array<i64: 256, 128>}, {pipeline_mode = #tpu.pipeline_mode<synchronous>, transform_indices = @transform_4, window_bounds = array<i64: 1, 128>}, {pipeline_mode = #tpu.pipeline_mode<synchronous>, transform_indices = @transform_5, window_bounds = array<i64: 1, 128>}, {pipeline_mode = #tpu.pipeline_mode<synchronous>, transform_indices = @transform_6, window_bounds = array<i64: 1, 1>}, {transform_indices = @transform_7, window_bounds = array<i64: 1, 1, 32>}]} {
    %c0 = arith.constant 0 : index
    %c0_0 = arith.constant 0 : index
    %0 = vector.load %arg1[%c0, %c0_0] : memref<32x37xbf16, #tpu.memory_space<vmem>>, vector<32x37xbf16>
    %c0_1 = arith.constant 0 : index
    %c0_2 = arith.constant 0 : index
    %1 = vector.load %arg2[%c0_1, %c0_2] : memref<37x384xbf16, #tpu.memory_space<vmem>>, vector<37x384xbf16>
    %cst = arith.constant dense<0.000000e+00> : vector<32x384xf32>
    %2 = tpu.matmul %0, %1, %cst {dimension_numbers = #tpu.dot_dimension_numbers<[1], [0], [0], [1], [0, 0, 1, 1], [], []>} : vector<32x37xbf16>, vector<37x384xbf16>, vector<32x384xf32> -> vector<32x384xf32>
    %3 = vector.extract_strided_slice %2 {offsets = [0, 0], sizes = [32, 256], strides = [1, 1]} : vector<32x384xf32> to vector<32x256xf32>
    %c0_3 = arith.constant 0 : index
    %c0_4 = arith.constant 0 : index
    %4 = vector.load %arg3[%c0_3, %c0_4] : memref<1x256xf32, #tpu.memory_space<vmem>>, vector<1x256xf32>
    %5 = vector.broadcast %4 : vector<1x256xf32> to vector<32x256xf32>
    %6 = arith.addf %3, %5 : vector<32x256xf32>
    %cst_5 = arith.constant 0.000000e+00 : f32
    %7 = vector.broadcast %cst_5 : f32 to vector<32x256xf32>
    %8 = arith.maximumf %6, %7 : vector<32x256xf32>
    %9 = arith.truncf %8 : vector<32x256xf32> to vector<32x256xbf16>
    %c0_6 = arith.constant 0 : index
    %c0_7 = arith.constant 0 : index
    %10 = vector.load %arg4[%c0_6, %c0_7] : memref<256x128xbf16, #tpu.memory_space<vmem>>, vector<256x128xbf16>
    %cst_8 = arith.constant dense<0.000000e+00> : vector<32x128xf32>
    %11 = tpu.matmul %9, %10, %cst_8 {dimension_numbers = #tpu.dot_dimension_numbers<[1], [0], [0], [1], [0, 0, 1, 1], [], []>} : vector<32x256xbf16>, vector<256x128xbf16>, vector<32x128xf32> -> vector<32x128xf32>
    %12 = vector.extract_strided_slice %2 {offsets = [0, 256], sizes = [32, 128], strides = [1, 1]} : vector<32x384xf32> to vector<32x128xf32>
    %13 = arith.addf %11, %12 : vector<32x128xf32>
    %c0_9 = arith.constant 0 : index
    %c0_10 = arith.constant 0 : index
    %14 = vector.load %arg5[%c0_9, %c0_10] : memref<1x128xf32, #tpu.memory_space<vmem>>, vector<1x128xf32>
    %15 = vector.broadcast %14 : vector<1x128xf32> to vector<32x128xf32>
    %16 = arith.addf %13, %15 : vector<32x128xf32>
    %cst_11 = arith.constant 0.000000e+00 : f32
    %17 = vector.broadcast %cst_11 : f32 to vector<32x128xf32>
    %18 = arith.maximumf %16, %17 : vector<32x128xf32>
    %c0_12 = arith.constant 0 : index
    %c0_13 = arith.constant 0 : index
    %19 = vector.load %arg6[%c0_12, %c0_13] : memref<1x128xf32, #tpu.memory_space<vmem>>, vector<1x128xf32>
    %cst_14 = arith.constant dense<0.000000e+00> : vector<1x32xf32>
    %20 = tpu.matmul %19, %18, %cst_14 {dimension_numbers = #tpu.dot_dimension_numbers<[1], [1], [0], [0], [0, 0, 1, 0], [], []>} : vector<1x128xf32>, vector<32x128xf32>, vector<1x32xf32> -> vector<1x32xf32>
    %c0_15 = arith.constant 0 : index
    %c0_16 = arith.constant 0 : index
    %21 = vector.load %arg7[%c0_15, %c0_16] : memref<1x1xf32, #tpu.memory_space<vmem>>, vector<1x1xf32>
    %22 = vector.broadcast %21 : vector<1x1xf32> to vector<1x32xf32>
    %23 = arith.addf %20, %22 : vector<1x32xf32>
    %c0_17 = arith.constant 0 : index
    %c0_18 = arith.constant 0 : index
    %c0_19 = arith.constant 0 : index
    %24 = vector.load %arg8[%c0_17, %c0_18, %c0_19] : memref<1x1x32xf32, #tpu.memory_space<vmem>>, vector<1x1x32xf32>
    %25 = vector.shape_cast %24 : vector<1x1x32xf32> to vector<1x32xf32>
    %26 = vector.shape_cast %23 : vector<1x32xf32> to vector<1x1x32xf32>
    tpu.vector_store %arg8[%c0_17, %c0_18, %c0_19], %26 {strides = array<i32>} : memref<1x1x32xf32, #tpu.memory_space<vmem>>, vector<1x1x32xf32>,
    return
  }
  func.func @transform_0(%arg0: i32) -> (i32, i32) {
    %c0_i32 = arith.constant 0 : i32
    %c0_i32_0 = arith.constant 0 : i32
    return %arg0, %c0_i32 : i32, i32
  }
  func.func @transform_1(%arg0: i32) -> (i32, i32) {
    %c0_i32 = arith.constant 0 : i32
    %c0_i32_0 = arith.constant 0 : i32
    %c0_i32_1 = arith.constant 0 : i32
    return %c0_i32, %c0_i32_0 : i32, i32
  }
  func.func @transform_2(%arg0: i32) -> (i32, i32) {
    %c0_i32 = arith.constant 0 : i32
    %c0_i32_0 = arith.constant 0 : i32
    %c0_i32_1 = arith.constant 0 : i32
    return %c0_i32, %c0_i32_0 : i32, i32
  }
  func.func @transform_3(%arg0: i32) -> (i32, i32) {
    %c0_i32 = arith.constant 0 : i32
    %c0_i32_0 = arith.constant 0 : i32
    %c0_i32_1 = arith.constant 0 : i32
    return %c0_i32, %c0_i32_0 : i32, i32
  }
  func.func @transform_4(%arg0: i32) -> (i32, i32) {
    %c0_i32 = arith.constant 0 : i32
    %c0_i32_0 = arith.constant 0 : i32
    %c0_i32_1 = arith.constant 0 : i32
    return %c0_i32, %c0_i32_0 : i32, i32
  }
  func.func @transform_5(%arg0: i32) -> (i32, i32) {
    %c0_i32 = arith.constant 0 : i32
    %c0_i32_0 = arith.constant 0 : i32
    %c0_i32_1 = arith.constant 0 : i32
    return %c0_i32, %c0_i32_0 : i32, i32
  }
  func.func @transform_6(%arg0: i32) -> (i32, i32) {
    %c0_i32 = arith.constant 0 : i32
    %c0_i32_0 = arith.constant 0 : i32
    %c0_i32_1 = arith.constant 0 : i32
    return %c0_i32, %c0_i32_0 : i32, i32
  }
  func.func @transform_7(%arg0: i32) -> (i32, i32, i32) {
    %c0_i32 = arith.constant 0 : i32
    %c0_i32_0 = arith.constant 0 : i32
    %c0_i32_1 = arith.constant 0 : i32
    return %arg0, %c0_i32, %c0_i32_0 : i32, i32, i32
  }
}

</mosaic_0001>

<bundles_post_ra>
// kernel: critic_forward.1
= control target key start
LH: loop header
LB: loop body
LE: loop exit
PB: predicated region body
PF: predicated region fallthrough
CT: control target
= control target key end

     0   :  { %s833_s0 = inlined_call_operand.vmem [shape: bf16[32,37], index: 0, kind: input, shape index: {}]   ;;  %s834_s1 = inlined_call_operand.vmem [shape: bf16[37,384], index: 1, kind: input, shape index: {}]   ;;  %s835_s2 = inlined_call_operand.vmem [shape: f32[1,256], index: 2, kind: input, shape index: {}]   ;;  %s836_s3 = inlined_call_operand.hbm [shape: bf16[256,128], index: 3, kind: input, shape index: {}]   ;;  %s837_s4 = inlined_call_operand.vmem [shape: f32[1,128], index: 4, kind: input, shape index: {}]   ;;  %s838_s5 = inlined_call_operand.vmem [shape: f32[1,128], index: 5, kind: input, shape index: {}]   ;;  %s839_s6 = inlined_call_operand.<no memory space> [shape: f32[1,1], index: 6, kind: input, shape index: {}]   ;;  %s840_s7 = inlined_call_operand.hbm [shape: f32[1,1,32], index: 7, kind: output, shape index: {}]  }
   0x1   :  { %v12_v0 = vstv %s839_s6 }
   0x2   :  { %13 = vst [vmem:[#allocation2] sm:$0x1] %v12_v0 }
   0x3   :  { %14 = vsyncpa [#allocation4], 0 }
   0x4   :  { %15 = vsyncpa [#allocation5], 0  ;;  %s725_s26 = smov [#allocation3]  }
   0x5   :  { %s27_s27 = sshll.u32 %s725_s26, 4  ;;  %s28_s27 = int_to_ptr.vmem [resolvable:$true] %s27_s27 }
   0x6   :  { %s689_s28 = scalar_lea.vmem %s28_s27, 2048  ;;  %p694_p1 = scmp.lt.s32.totalorder %s28_s27, %s28_s27 }
   0x7   :  { %p690_p0 = scmp.ne.s32.totalorder %s28_s27, %s689_s28  ;;  %p695_p2 = scmp.lt.s32.totalorder %s689_s28, %s689_s28 }
   0x9   :  { %p696_p3 = por %p695_p2, %p694_p1 }
   0xb   :  { %p697_p4 = pnand %p696_p3, %p690_p0 }
   0xd   :  { %700 = shalt.err (!%p697_p4)
}
   0xe   :  { %s726_s29 = smov 64   ;;  %s727_s30 = smov 4  }
   0xf   :  { %33 = dma.hbm_to_vmem [thread:$0]  %s836_s3, 2048, %s28_s27, [#allocation4], %s726_s29, %s726_s29, %s727_s30  }
  0x10   :  { %721 = dma.done.wait [#allocation4], 2048  }
  0x11   :  { %722 = vsyncadd [#allocation4], 4294965248  ;;  %vm115_vm0 = vcmask 1041408   ;;  %v728_v1 = vmov 0   ;;  %vm116_vm1 = vcmask 1042432   ;;  %v729_v2 = vmov 65535  }
  0x12   :  { %160 = vmatprep.mubr.bf16.mxu1 %v728_v1  ;;  %651 = vset.pattern.permute.xlu0 %v728_v1  ;;  %v117_v3 = vsel %vm115_vm0, 4294967295, %v729_v2  ;;  %v56_v4 = vld [vmem:[%s834_s1 + $0x30] sm:$0x77]  ;;  %v654_v10 = vld [vmem:[%s834_s1 + $0x1c] ss:$12 sps:$4 sm:$0xff]   ;;  %v660_v19 = vld [vmem:[%s833_s0] sm:$0xff]   ;;  %v232_v36 = vlaneseq }
  0x13   :  { %v118_v5 = vsel %vm116_vm1, %v117_v3, 0  ;;  %v561_v6 = vcombine.high %v56_v4, %v56_v4  ;;  %v560_v7 = vcombine.low %v56_v4, %v56_v4  ;;  %v656_v11 = vld [vmem:[%s834_s1 + $0x18] ss:$12 sps:$4 sm:$0xff]   ;;  %v666_v17 = vld [vmem:[#allocation3 + $0x68] sm:$0xff]   ;;  %vm108_vm2 = vcmask 302080   ;;  %s732_s30 = smov [#allocation6]  }
  0x14   :  { %v657_v12 = vld [vmem:[%s834_s1 + $0x4] ss:$12 sps:$4 sm:$0xff]   ;;  %v662_v13 = vld [vmem:[#allocation3 + $0x78] sm:$0xff]   ;;  %v661_v25 = vld [vmem:[%s833_s0 + $0x8] sm:$0xff]   ;;  %v813_v37 = vshrl.u32 %v232_v36, 7  ;;  %vm731_vm3 = vmmov 0  }
  0x15   :  { %v123_v8 = vand.u32 %v561_v6, %v118_v5  ;;  %v120_v9 = vand.u32 %v560_v7, %v118_v5  ;;  %v663_v14 = vld [vmem:[#allocation3 + $0x38] sm:$0xff]   ;;  %589 = vmatprep.subr.bf16.mxu0 %v662_v13  ;;  %v664_v15 = vld [vmem:[#allocation3 + $0x70] sm:$0xff]   ;;  %v667_v20 = vld [vmem:[#allocation3 + $0x28] sm:$0xff]   ;;  %v730_v7 = vmov 0.0   ;;  %s543_s8 = sshll.u32 %s732_s30, 4  ;;  %vm535_vm4 = vcmask 253952   ;;  %s544_s8 = int_to_ptr.vmem [resolvable:$true] %s543_s8 }
  0x16   :  { %590 = vmatpush3.bf16.msra.mxu0 %v663_v14  ;;  %v665_v16 = vld [vmem:[#allocation3 + $0x30] sm:$0xff]   ;;  %v659_v18 = vld [vmem:[%s834_s1] ss:$12 sps:$4 sm:$0xff]   ;;  %v238_v38 = vsub.s32 1, %v813_v37  ;;  %v234_v39 = vsub.s32 0, %v813_v37  ;;  %s701_s9 = scalar_lea.vmem %s544_s8, 16  ;;  %p706_p6 = scmp.lt.s32.totalorder %s544_s8, %s544_s8 }
  0x17   :  { %138 = vmatprep.subr.bf16.mxu1 %v123_v8  ;;  %591 = vmatprep.subr.bf16.mxu0 %v664_v15  ;;  %v668_v21 = vld [vmem:[#allocation3 + $0x60] sm:$0xff]   ;;  %v670_v23 = vld [vmem:[#allocation3 + $0x58] sm:$0xff]   ;;  %v672_v26 = vld [vmem:[#allocation3 + $0x50] sm:$0xff]   ;;  %p702_p5 = scmp.ne.s32.totalorder %s544_s8, %s701_s9  ;;  %s705_s6 = scalar_lea.vmem %s544_s8, 32 }
  0x18   :  { %139 = vmatpush1.bf16.msra.mxu1 %v120_v9  ;;  %v669_v22 = vld [vmem:[#allocation3 + $0x20] sm:$0xff]   ;;  %v671_v24 = vld [vmem:[#allocation3 + $0x18] sm:$0xff]   ;;  %v674_v27 = vld [vmem:[%s834_s1 + $0x38] ss:$0 sps:$4 sm:$0x77]   ;;  %p707_p7 = scmp.lt.s32.totalorder %s705_s6, %s701_s9 }
  0x19   :  { %140 = vmatprep.subr.bf16.mxu1 %v654_v10  ;;  %v673_v28 = vld [vmem:[#allocation3 + $0x10] sm:$0xff]   ;;  %v126_v29 = vand.u32 %v674_v27, %v118_v5  ;;  %v675_v30 = vld [vmem:[#allocation3 + $0x48] sm:$0xff]   ;;  %v678_v33 = vld [vmem:[#allocation3 + $0x40] sm:$0xff]  }
  0x1a   :  { %592 = vmatpush3.bf16.msra.mxu0 %v665_v16  ;;  %v676_v31 = vld [vmem:[#allocation3 + $0x8] sm:$0xff]   ;;  %v679_v34 = vld [vmem:[#allocation3] sm:$0xff]   ;;  %v455_v8 = vld [vmem:[#allocation2] sm:$0x1]  ;;  %p708_p8 = por %p707_p7, %p706_p6 }
  0x1b   :  { %593 = vmatprep.subr.bf16.mxu0 %v666_v17  ;;  %v677_v32 = vld [vmem:[%s834_s1 + $0x20] ss:$12 sps:$4 sm:$0xff]   ;;  %v680_v35 = vld [vmem:[%s834_s1 + $0x8] ss:$12 sps:$4 sm:$0xff]   ;;  %458 = vperm.xlu0 %651, %v455_v8  }
  0x1c   :  { %141 = vmatpush1.bf16.msra.mxu1 %v656_v11  ;;  %v230_v40 = vld [vmem:[%s835_s2] sm:$0x3]  ;;  %p709_p9 = pnand %p708_p8, %p702_p5 }
  0x1d   :  { %142 = vmatprep.subr.bf16.mxu1 %v657_v12  ;;  %v239_v42 = vrot.slane %v230_v40, %v238_v38  ;;  %v235_v43 = vrot.slane %v230_v40, %v234_v39  ;;  %v454_v40 = vld [vmem:[%s838_s5] sm:$0x1] }
  0x1e   :  { %594 = vmatpush3.bf16.msra.mxu0 %v667_v20 }
  0x1f   :  { %595 = vmatprep.subr.bf16.mxu0 %v668_v21 }
  0x20   :  { %143 = vmatpush1.bf16.msra.mxu1 %v659_v18 }
  0x21   :  { %622 = vmatprep.subr.bf16.mxu1 %v126_v29 }
  0x22   :  { %596 = vmatpush3.bf16.msra.mxu0 %v669_v22 }
  0x23   :  { %563 = vmatmul.mubr.msk.bf16.vlgmr.msra.gmra.mxu1 %vm108_vm2, %v660_v19  ;;  %597 = vmatprep.subr.bf16.mxu0 %v670_v23 }
  0x24   :  { %170 = vmatprep.mubr.bf16.mxu1 %v728_v1  ;;  %623 = vmatpush3.bf16.msra.mxu1 %v126_v29 }
  0x25   :  { %624 = vmatprep.subr.bf16.mxu1 %v677_v32 }
  0x26   :  { %598 = vmatpush3.bf16.msra.mxu0 %v671_v24 }
  0x27   :  { %599 = vmatprep.subr.bf16.mxu0 %v672_v26 }
  0x28   :  { %625 = vmatpush3.bf16.msra.mxu1 %v677_v32 }
  0x29   :  { %626 = vmatprep.subr.bf16.mxu1 %v680_v35 }
  0x2a   :  { %600 = vmatpush3.bf16.msra.mxu0 %v673_v28 }
  0x2b   :  { %564 = vmatmul.mubr.msk.bf16.gmra.mxu1 %vm108_vm2, %v661_v25  ;;  %601 = vmatprep.subr.bf16.mxu0 %v675_v30 }
  0x2c   :  { %628 = vmatprep.mubr.msk.bf16.mxu1 %vm108_vm2, %v660_v19  ;;  %627 = vmatpush3.bf16.msra.mxu1 %v680_v35 }
  0x2d   :  { %632 = vmatprep.subr.mxu1 %v730_v7 }
  0x2e   :  { %602 = vmatpush3.bf16.msra.mxu0 %v676_v31 }
  0x2f   :  { %603 = vmatprep.subr.bf16.mxu0 %v678_v33 }
  0x32   :  { %604 = vmatpush3.bf16.msra.mxu0 %v679_v34 }
  0x33   :  { %629 = vmatmul.mubr.msk.bf16.vlgmr.msra.gmra.mxu1 %vm108_vm2, %v661_v25  ;;  %v583_v25 = vld [vmem:[%s837_s4] ss:$0 sm:$0xff] }
  0x34   :  { %640 = vmatprep.mubr.msk.f32.mxu1 %vm731_vm3, %v730_v7 }
  0xe3   :  { %v162_v41 = vpop.f32.mrf.mxu1 }
  0xe4   :  { %v242_v48 = vadd.f32 %v235_v43, %v162_v41  ;;  %v459_v41 = vpop.permute.xlu0 %458 }
  0xe5   :  { %v164_v44 = vpop.f32.mrf.mxu1 }
  0xe6   :  { %v243_v46 = vadd.f32 %v239_v42, %v164_v44  ;;  %v250_v55 = vmax.f32 %v242_v48, 0.0 }
  0xe7   :  { %v166_v45 = vpop.f32.mrf.mxu1 }
  0xe8   :  { %v244_v47 = vadd.f32 %v235_v43, %v166_v45  ;;  %v251_v53 = vmax.f32 %v243_v46, 0.0 }
  0xe9   :  { %v168_v49 = vpop.f32.mrf.mxu1 }
  0xea   :  { %v245_v50 = vadd.f32 %v239_v42, %v168_v49  ;;  %v252_v51 = vmax.f32 %v244_v47, 0.0 }
  0xeb   :  { %v172_v52 = vpop.f32.mrf.mxu1 }
  0xec   :  { %v253_v54 = vmax.f32 %v245_v50, 0.0  ;;  %v258_v58 = vpack.c.bf16 %v252_v51, %v250_v55  ;;  %v246_v62 = vadd.f32 %v235_v43, %v172_v52 }
  0xed   :  { %v174_v56 = vpop.f32.mrf.mxu1 }
  0xee   :  { %v259_v57 = vpack.c.bf16 %v253_v54, %v251_v53  ;;  %v247_v60 = vadd.f32 %v239_v42, %v174_v56  ;;  %v254_v4 = vmax.f32 %v246_v62, 0.0 }
  0xef   :  { %v176_v59 = vpop.f32.mrf.mxu1 }
  0xf0   :  { %v248_v61 = vadd.f32 %v235_v43, %v176_v59  ;;  %422 = vmatprep.mubr.bf16.mxu0 %v259_v57  ;;  %v255_v2 = vmax.f32 %v247_v60, 0.0 }
  0xf1   :  { %v178_v63 = vpop.f32.mrf.mxu1  ;;  %423 = vmatmul.mubr.bf16.vlgmr.msra.gmra.mxu0 %v258_v58 }
  0xf2   :  { %v249_v0 = vadd.f32 %v239_v42, %v178_v63  ;;  %v256_v1 = vmax.f32 %v248_v61, 0.0  ;;  %v464_v42 = vrot.slane %v459_v41, %v234_v39 }
  0xf3   :  { %v630_v12 = vpop.f32.mrf.mxu1 }
  0xf4   :  { %v257_v3 = vmax.f32 %v249_v0, 0.0  ;;  %v260_v6 = vpack.c.bf16 %v256_v1, %v254_v4 }
  0xf5   :  { %v215_v15 = vpop.f32.mrf.mxu1 }
  0xf6   :  { %v261_v5 = vpack.c.bf16 %v257_v3, %v255_v2 }
  0xf7   :  { %v631_v19 = vpop.f32.mrf.mxu1 }
  0xf8   :  { %430 = vmatprep.mubr.bf16.mxu0 %v261_v5 }
  0xf9   :  { %431 = vmatmul.mubr.bf16.gmra.mxu0 %v260_v6  ;;  %v218_v26 = vpop.f32.mrf.mxu1 }
 0x1b1   :  { %v605_v9 = vpop.f32.mrf.mxu0 }
 0x1b3   :  { %v606_v10 = vpop.f32.mrf.mxu0 }
 0x1b4   :  { %v607_v28 = vadd.f32 %v606_v10, %v605_v9 }
 0x1b5   :  { %v608_v11 = vpop.f32.mrf.mxu0 }
 0x1b6   :  { %v425_v32 = vadd.f32 %v607_v28, %v215_v15 }
 0x1b7   :  { %v609_v13 = vpop.f32.mrf.mxu0 }
 0x1b8   :  { %v610_v22 = vadd.f32 %v609_v13, %v608_v11  ;;  %v446_v35 = vadd.f32 %v583_v25, %v425_v32 }
 0x1b9   :  { %v611_v14 = vpop.f32.mrf.mxu0 }
 0x1ba   :  { %v428_v29 = vadd.f32 %v610_v22, %v218_v26  ;;  %v450_v38 = vmax.f32 %v446_v35, 0.0 }
 0x1bb   :  { %v612_v16 = vpop.f32.mrf.mxu0 }
 0x1bc   :  { %v613_v18 = vadd.f32 %v612_v16, %v611_v14  ;;  %v447_v33 = vadd.f32 %v583_v25, %v428_v29 }
 0x1bd   :  { %v614_v17 = vpop.f32.mrf.mxu0 }
 0x1be   :  { %v433_v23 = vadd.f32 %v630_v12, %v613_v18  ;;  %v451_v36 = vmax.f32 %v447_v33, 0.0 }
 0x1bf   :  { %v615_v20 = vpop.f32.mrf.mxu0 }
 0x1c0   :  { %v616_v21 = vadd.f32 %v615_v20, %v614_v17  ;;  %v448_v30 = vadd.f32 %v583_v25, %v433_v23 }
 0x1c2   :  { %v436_v24 = vadd.f32 %v631_v19, %v616_v21  ;;  %v452_v34 = vmax.f32 %v448_v30, 0.0 }
 0x1c4   :  { %v449_v27 = vadd.f32 %v583_v25, %v436_v24 }
 0x1c6   :  { %v453_v31 = vmax.f32 %v449_v27, 0.0 }
 0x1c8   :  { %633 = vmatpush3.xpose.msra.mxu1 %v453_v31 }
 0x1c9   :  { %634 = vmatprep.subr.mxu1 %v730_v7 }
 0x1cc   :  { %635 = vmatpush3.xpose.msra.mxu1 %v452_v34 }
 0x1cd   :  { %636 = vmatprep.subr.mxu1 %v730_v7 }
 0x1d0   :  { %637 = vmatpush3.xpose.msra.mxu1 %v451_v36 }
 0x1d1   :  { %638 = vmatprep.subr.mxu1 %v730_v7 }
 0x1d4   :  { %639 = vmatpush3.xpose.msra.mxu1 %v450_v38 }
 0x1d7   :  { %641 = vmatmul.mubr.f32.vlgmr.msra.gmra.mxu1 %v454_v40 }
 0x297   :  { %v531_v43 = vpop.f32.mrf.mxu1 }
 0x298   :  { %v532_v44 = vadd.f32 %v531_v43, %v464_v42 }
 0x299   :  { %v642_v45 = vpop.f32.mrf.mxu1 }
 0x29a   :  { %536 = vst.msk [vmem:[#allocation6] sm:$0x1] %vm535_vm4, %v532_v44 }
 0x29b   :  { %712 = shalt.err (!%p709_p9)
}
 0x29c   :  { %546 = dma.vmem_to_hbm [thread:$0]  %s544_s8, 16, %s840_s7, [#allocation5]  }
 0x29d   :  { %723 = dma.done.wait [#allocation5], 16  }
 0x29e   :  { %724 = vsyncadd [#allocation5], 4294967280 }
 0x29f   :  { %550 = vsyncpa [#allocation4], 1 }
 0x2a0   :  { %551 = vsyncpa [#allocation5], 1 }

</bundles_post_ra>
